<compile_context>
chip_gen: v7x
topology: tpu7x:2x2x1
jax: 0.10.0
libtpu: 0.0.40
codegen_flags: <defaults>
</compile_context>

<pallas_src>
import functools
from typing import NamedTuple, Optional

import jax
import jax.numpy as jnp
from jax.experimental import pallas as pl
from jax.experimental.pallas import tpu as pltpu


LANE = 128


def _round_up(x, m):
    return (x + m - 1) // m * m


# ---------------------------------------------------------------------------
# One-time graph preprocessing (hoisted out of the forward pass)
# ---------------------------------------------------------------------------
class Graph(NamedTuple):
    a_p: jax.Array          # (n_pad, n_pad) padded, compute-dtype adjacency
    block_ids: jax.Array    # (nb, max_blocks) int32: k index of j-th nonzero block
    num_blocks: jax.Array   # (nb,) int32: nonzero block count per row tile
    n: int
    n_pad: int
    tile: int
    nb: int
    max_blocks: int
    total_blocks: int


def prepare_adjacency(a_hat, *, tile=None, dtype=jnp.bfloat16):
    """Pad + cast A_hat and build the block-sparsity tables (run once, eagerly:
    it reads concrete block counts to size the kernel grid)."""
    n = a_hat.shape[0]
    assert a_hat.shape == (n, n)
    if tile is None:
        # >= 2 row tiles keeps both v7x TensorCores busy on small graphs.
        tile = 512 if n >= 1024 else 256
    n_pad = _round_up(n, tile)
    nb = n_pad // tile

    a_p = jnp.zeros((n_pad, n_pad), dtype).at[:n, :n].set(a_hat.astype(dtype))

    # Block-level nonzero pattern of A_hat.
    blk_nz = jnp.any(a_p.reshape(nb, tile, nb, tile) != 0, axis=(1, 3))  # (nb, nb)
    num_blocks = jnp.sum(blk_nz, axis=1).astype(jnp.int32)               # (nb,)
    max_blocks = max(int(jnp.max(num_blocks)), 1)
    total_blocks = max(int(jnp.sum(num_blocks)), 1)

    # Nonzero block column-indices first (ascending); zero blocks sorted last.
    idx = jnp.arange(nb)[None, :]
    sort_key = jnp.where(blk_nz, idx, nb)
    order = jnp.argsort(sort_key, axis=1)
    block_ids = order[:, :max_blocks].astype(jnp.int32)                  # (nb, max_blocks)

    return Graph(a_p, block_ids, num_blocks, n, n_pad, tile, nb,
                 max_blocks, total_blocks)


# ---------------------------------------------------------------------------
# Feature transform:  XW = X @ W   (computed once per layer, row-tiled)
# ---------------------------------------------------------------------------
def _feature_transform_kernel(x_ref, w_ref, o_ref):
    o_ref[...] = jnp.dot(
        x_ref[...], w_ref[...], preferred_element_type=jnp.float32
    ).astype(o_ref.dtype)


def feature_transform(x, w, *, tm, out_dtype=jnp.bfloat16):
    n, fin = x.shape
    fout = w.shape[1]
    assert n % tm == 0 and fout % LANE == 0

    return pl.pallas_call(
        _feature_transform_kernel,
        out_shape=jax.ShapeDtypeStruct((n, fout), out_dtype),
        grid_spec=pltpu.PrefetchScalarGridSpec(
            num_scalar_prefetch=0,
            grid=(n // tm,),
            in_specs=[
                pl.BlockSpec((tm, fin), lambda i: (i, 0)),     # X row tile
                pl.BlockSpec((fin, fout), lambda i: (0, 0)),   # W (full, small)
            ],
            out_specs=pl.BlockSpec((tm, fout), lambda i: (i, 0)),
        ),
        compiler_params=pltpu.CompilerParams(
            dimension_semantics=("parallel",),
            vmem_limit_bytes=32 * 1024 * 1024),
    )(x, w)


# ---------------------------------------------------------------------------
# Block-sparse aggregation:  out = epilogue( A_hat @ XW + b )
#   epilogue = activation -> (optional fused @ W2) -> (optional log_softmax)
# ---------------------------------------------------------------------------
def _make_aggregate_kernel(*, tile, xw_resident, fuse_w2, activation,
                           log_softmax_out, valid_cols):
    def kernel(bids_ref, nblk_ref, a_ref, xw_ref, b_ref, *rest):
        if fuse_w2:
            w2_ref, o_ref, acc_ref = rest
        else:
            o_ref, acc_ref = rest

        i = pl.program_id(0)
        j = pl.program_id(1)

        @pl.when(j == 0)
        def _():
            acc_ref[...] = jnp.zeros_like(acc_ref)

        # Skip padded (all-zero) adjacency blocks of this row tile.
        @pl.when(j < nblk_ref[i])
        def _():
            if xw_resident:
                kblk = bids_ref[i, j]
                start = pl.multiple_of(kblk * tile, tile)
                xw_blk = xw_ref[pl.ds(start, tile), :]
            else:
                xw_blk = xw_ref[...]
            acc_ref[...] += jnp.dot(
                a_ref[...], xw_blk, preferred_element_type=jnp.float32)

        @pl.when(j == pl.num_programs(1) - 1)
        def _():
            h = acc_ref[...] + b_ref[...]
            if activation == "relu":
                h = jnp.maximum(h, 0.0)
            elif activation == "elu":
                h = jnp.where(h > 0.0, h, jnp.expm1(h))
            if fuse_w2:
                # Fused next-layer feature transform: out = act(h) @ W2.
                out = jnp.dot(h.astype(w2_ref.dtype), w2_ref[...],
                              preferred_element_type=jnp.float32)
            else:
                out = h
            if log_softmax_out:
                # Padded class lanes must not contribute to the normalizer.
                col = jax.lax.broadcasted_iota(jnp.int32, out.shape, 1)
                om = jnp.where(col < valid_cols, out, -jnp.inf)
                m = jnp.max(om, axis=1, keepdims=True)
                lse = m + jnp.log(
                    jnp.sum(jnp.exp(om - m), axis=1, keepdims=True))
                out = out - lse
            o_ref[...] = out.astype(o_ref.dtype)

    return kernel


def aggregate(graph: Graph, xw, bias, *, w2=None, activation=None,
              log_softmax_out=False, valid_cols=None,
              out_dtype=jnp.float32, xw_resident: Optional[bool] = None):
    tile, n_pad, nb = graph.tile, graph.n_pad, graph.nb
    fin = xw.shape[1]
    assert xw.shape == (n_pad, fin) and fin % LANE == 0
    fout = w2.shape[1] if w2 is not None else fin
    assert fout % LANE == 0
    assert bias.shape == (1, fin)
    if valid_cols is None:
        valid_cols = fout

    xw_bytes = xw.size * xw.dtype.itemsize
    if xw_resident is None:
        # Keep ~2x XW (double buffering) + A tiles + acc + out well under
        # v7x's 64 MiB VMEM; fall back to K-streamed XW for huge graphs.
        xw_resident = 2 * xw_bytes <= 32 * 1024 * 1024

    kernel = _make_aggregate_kernel(
        tile=tile, xw_resident=xw_resident, fuse_w2=w2 is not None,
        activation=activation, log_softmax_out=log_softmax_out,
        valid_cols=valid_cols)

    if xw_resident:
        # Full XW resident in VMEM for the whole grid; sliced in-kernel.
        xw_spec = pl.BlockSpec((n_pad, fin), lambda i, j, bids, nblk: (0, 0))
    else:
        xw_spec = pl.BlockSpec((tile, fin),
                               lambda i, j, bids, nblk: (bids[i, j], 0))

    in_specs = [
        # A_hat tile: k index comes from the prefetched nonzero-block table.
        pl.BlockSpec((tile, tile), lambda i, j, bids, nblk: (i, bids[i, j])),
        xw_spec,
        pl.BlockSpec((1, fin), lambda i, j, bids, nblk: (0, 0)),        # bias
    ]
    args = [graph.block_ids, graph.num_blocks, graph.a_p, xw, bias]
    if w2 is not None:
        in_specs.append(
            pl.BlockSpec((fin, fout), lambda i, j, bids, nblk: (0, 0)))  # W2
        args.append(w2)

    a_item = graph.a_p.dtype.itemsize
    flops = 2 * graph.total_blocks * tile * tile * fin
    if w2 is not None:
        flops += 2 * n_pad * fin * fout
    cost = pl.CostEstimate(
        flops=flops,
        transcendentals=(n_pad * fout if log_softmax_out else 0),
        bytes_accessed=(graph.total_blocks * tile * tile * a_item
                        + (xw_bytes if xw_resident
                           else graph.total_blocks * tile * fin
                           * xw.dtype.itemsize)
                        + n_pad * fout * jnp.dtype(out_dtype).itemsize))

    return pl.pallas_call(
        kernel,
        out_shape=jax.ShapeDtypeStruct((n_pad, fout), out_dtype),
        grid_spec=pltpu.PrefetchScalarGridSpec(
            num_scalar_prefetch=2,
            grid=(nb, graph.max_blocks),
            in_specs=in_specs,
            out_specs=pl.BlockSpec((tile, fout),
                                   lambda i, j, bids, nblk: (i, 0)),
            scratch_shapes=[pltpu.VMEM((tile, fin), jnp.float32)],
        ),
        compiler_params=pltpu.CompilerParams(
            dimension_semantics=("parallel", "arbitrary"),
            vmem_limit_bytes=48 * 1024 * 1024),
        cost_estimate=cost,
    )(*args)


# ---------------------------------------------------------------------------
# Full forward pass
# ---------------------------------------------------------------------------
def gcn_forward(graph: Graph, x, params, *, activation="relu",
                compute_dtype=jnp.bfloat16):
    """GCN.forward: gc1 -> dropout(identity at inference) -> gc2 -> log_softmax."""
    w1, b1, w2, b2 = params
    n, fin = x.shape
    assert n == graph.n
    n_hidden = w1.shape[1]
    n_classes = w2.shape[1]
    n_pad, tile = graph.n_pad, graph.tile
    f32 = jnp.float32

    h_pad = _round_up(n_hidden, LANE)
    c_pad = _round_up(n_classes, LANE)

    # Zero-pad X rows and W/b lanes (mathematically inert for A_hat @ (X @ W);
    # padded output rows/lanes are sliced off).
    x_p = jnp.zeros((n_pad, fin), compute_dtype).at[:n, :].set(
        x.astype(compute_dtype))
    w1_p = jnp.zeros((fin, h_pad), compute_dtype).at[:, :n_hidden].set(
        w1.astype(compute_dtype))
    b1_p = jnp.zeros((1, h_pad), f32).at[:, :n_hidden].set(b1.reshape(1, -1))
    w2_p = jnp.zeros((h_pad, c_pad), compute_dtype).at[:n_hidden, :n_classes].set(
        w2.astype(compute_dtype))
    b2_p = jnp.zeros((1, c_pad), f32).at[:, :n_classes].set(b2.reshape(1, -1))

    # Layer 1 feature transform: XW1 = X @ W1 (once).
    xw1 = feature_transform(x_p, w1_p, tm=tile, out_dtype=compute_dtype)

    # Layer 1 aggregation + activation, with the layer-2 feature transform
    # (H @ W2) fused into the epilogue so H never round-trips through HBM.
    # F.dropout(..., training=False) is identity at inference time.
    xw2 = aggregate(graph, xw1, b1_p, w2=w2_p, activation=activation,
                    out_dtype=compute_dtype)

    # Layer 2 aggregation + bias + log_softmax over the real class lanes.
    z = aggregate(graph, xw2, b2_p, activation=None, log_softmax_out=True,
                  valid_cols=n_classes, out_dtype=f32)

    return z[:n, :n_classes]


# ---------------------------------------------------------------------------
# Pure-JAX reference (mirrors the kernel's bf16 cast points).
# ---------------------------------------------------------------------------
def _reference_forward(a_hat, x, params, *, activation="relu",
                       compute_dtype=jnp.bfloat16):
    w1, b1, w2, b2 = params
    f32 = jnp.float32
    cast = lambda v: v.astype(compute_dtype).astype(f32)

    a = cast(a_hat)
    xw1 = cast(jnp.dot(cast(x), cast(w1), preferred_element_type=f32))
    h = a @ xw1 + b1.reshape(1, -1)
    if activation == "relu":
        h = jnp.maximum(h, 0.0)
    else:
        h = jnp.where(h > 0.0, h, jnp.expm1(h))
    xw2 = cast(jnp.dot(cast(h), cast(w2), preferred_element_type=f32))
    z = a @ xw2 + b2.reshape(1, -1)
    return jax.nn.log_softmax(z, axis=1)


if __name__ == "__main__":
    # Small, deterministic synthetic problem (non-multiple N exercises padding,
    # multiple row/k blocks exercise the block-sparse scalar-prefetch path).
    N = 300            # number of nodes
    IN_FEATS = 16
    N_UNITS = 32
    OUT_FEATS = 8      # number of classes
    ACTIVATION = "relu"

    key = jax.random.PRNGKey(0)
    k_adj, k_x, k_w1, k_w2 = jax.random.split(key, 4)

    # Random undirected graph -> symmetrically normalized adjacency + self-loops.
    logits = jax.random.uniform(k_adj, (N, N))
    adj = (logits < 0.05).astype(jnp.float32)
    adj = jnp.maximum(adj, adj.T)
    adj = adj + jnp.eye(N, dtype=jnp.float32)
    deg = jnp.sum(adj, axis=1)
    d_inv_sqrt = 1.0 / jnp.sqrt(deg)
    a_hat = adj * d_inv_sqrt[:, None] * d_inv_sqrt[None, :]

    x = jax.random.normal(k_x, (N, IN_FEATS), dtype=jnp.float32)

    def glorot(k, fan_in, fan_out):
        lim = jnp.sqrt(6.0 / (fan_in + fan_out))
        return jax.random.uniform(k, (fan_in, fan_out), jnp.float32, -lim, lim)

    w1 = glorot(k_w1, IN_FEATS, N_UNITS)
    b1 = jnp.zeros((1, N_UNITS), jnp.float32)
    w2 = glorot(k_w2, N_UNITS, OUT_FEATS)
    b2 = jnp.zeros((1, OUT_FEATS), jnp.float32)
    params = (w1, b1, w2, b2)

    # One-time graph prep (pad + bf16 cast + block-sparsity tables), hoisted
    # out of the forward pass so repeated inference never redoes it.
    graph = prepare_adjacency(a_hat)

    out = gcn_forward(graph, x, params, activation=ACTIVATION)
    out = jax.block_until_ready(out)

    ref = _reference_forward(a_hat, x, params, activation=ACTIVATION)
    assert out.shape == (N, OUT_FEATS)
    err = float(jnp.max(jnp.abs(out - ref)))
    assert jnp.allclose(out, ref, atol=5e-3, rtol=5e-3), err

    print("KERNEL_OK")
</pallas_src>

<mosaic_0001>
module attributes {stable_mosaic.version = 11 : i64} {
  func.func @_feature_transform_kernel(%arg0: i32, %arg1: memref<256x16xbf16, #tpu.memory_space<vmem>>, %arg2: memref<16x128xbf16, #tpu.memory_space<vmem>>, %arg3: memref<256x128xbf16, #tpu.memory_space<vmem>>) attributes {dimension_semantics = [#tpu.dimension_semantics<parallel>], iteration_bounds = array<i64: 2>, scalar_prefetch = 0 : i64, scratch_operands = 0 : i64, tpu.core_type = #tpu.core_type<tc>, window_params = [{transform_indices = @transform_0, window_bounds = array<i64: 256, 16>}, {pipeline_mode = #tpu.pipeline_mode<synchronous>, transform_indices = @transform_1, window_bounds = array<i64: 16, 128>}, {transform_indices = @transform_2, window_bounds = array<i64: 256, 128>}]} {
    %c0 = arith.constant 0 : index
    %c0_0 = arith.constant 0 : index
    %0 = vector.load %arg1[%c0, %c0_0] : memref<256x16xbf16, #tpu.memory_space<vmem>>, vector<256x16xbf16>
    %c0_1 = arith.constant 0 : index
    %c0_2 = arith.constant 0 : index
    %1 = vector.load %arg2[%c0_1, %c0_2] : memref<16x128xbf16, #tpu.memory_space<vmem>>, vector<16x128xbf16>
    %cst = arith.constant dense<0.000000e+00> : vector<256x128xf32>
    %2 = tpu.matmul %0, %1, %cst {dimension_numbers = #tpu.dot_dimension_numbers<[1], [0], [0], [1], [0, 0, 1, 1], [], []>} : vector<256x16xbf16>, vector<16x128xbf16>, vector<256x128xf32> -> vector<256x128xf32>
    %3 = arith.truncf %2 : vector<256x128xf32> to vector<256x128xbf16>
    %c0_3 = arith.constant 0 : index
    %c0_4 = arith.constant 0 : index
    %4 = vector.load %arg3[%c0_3, %c0_4] : memref<256x128xbf16, #tpu.memory_space<vmem>>, vector<256x128xbf16>
    tpu.vector_store %arg3[%c0_3, %c0_4], %3 {strides = array<i32>} : memref<256x128xbf16, #tpu.memory_space<vmem>>, vector<256x128xbf16>,
    return
  }
  func.func @transform_0(%arg0: i32) -> (i32, i32) {
    %c0_i32 = arith.constant 0 : i32
    %c0_i32_0 = arith.constant 0 : i32
    return %arg0, %c0_i32 : i32, i32
  }
  func.func @transform_1(%arg0: i32) -> (i32, i32) {
    %c0_i32 = arith.constant 0 : i32
    %c0_i32_0 = arith.constant 0 : i32
    %c0_i32_1 = arith.constant 0 : i32
    return %c0_i32, %c0_i32_0 : i32, i32
  }
  func.func @transform_2(%arg0: i32) -> (i32, i32) {
    %c0_i32 = arith.constant 0 : i32
    %c0_i32_0 = arith.constant 0 : i32
    return %arg0, %c0_i32 : i32, i32
  }
}

</mosaic_0001>

<bundles_post_ra>
// kernel: tpu_custom_call.1
= control target key start
LH: loop header
LB: loop body
LE: loop exit
PB: predicated region body
PF: predicated region fallthrough
CT: control target
= control target key end

     0   :  { %7 = vsyncpa [#allocation3], 0  ;;  %s1272_s0 = inlined_call_operand.vmem [shape: bf16[512,16], index: 0, kind: input, shape index: {}]   ;;  %s1273_s1 = inlined_call_operand.vmem [shape: bf16[16,128], index: 1, kind: input, shape index: {}]   ;;  %s1274_s2 = inlined_call_operand.hbm [shape: bf16[512,128], index: 2, kind: output, shape index: {}]  }
   0x1   :  { %9 = vsyncpa [#allocation3 + $0x1], 0  ;;  %s1110_s9 = smov 0   ;;  %s1112_s10 = smov 0  }
   0x2   :  { %s1114_s11 = smov 0   ;;  %s1116_s12 = smov 0  }
   0x3 LB: > { %s1131_s13 = sadd.s32 4294967295, %s1090_s12   ;;  %s712_s14 = sadd.s32 4294967294, %s1090_s12   ;;  %s1090_s12 = sphi %s1116_s12, %s1280_s12   ;;  %s1086_s11 = sphi %s1114_s11, %s1279_s11   ;;  %s1082_s10 = sphi %s1112_s10, %s1278_s10   ;;  %s1078_s9 = sphi %s1110_s9, %s1277_s9  }
   0x4   : > { %s1135_s15 = sadd.s32 1, %s1090_s12   ;;  %s69_s16 = sadd.s32 1, %s1086_s11 }
   0x5   : > { %s66_s17 = ssub.s32 %s1090_s12, %s1135_s15  ;;  %p79_p0 = scmp.ne.s32.totalorder %s1086_s11, %s1082_s10 }
   0x6   : > { %p67_p1 = scmp.eq.s32.totalorder %s66_s17, 0  ;;  %p80_p2 = scmp.eq.s32.totalorder %s1131_s13, 1 }
   0x7   : > { %p85_p3 = scmp.ne.s32.totalorder %s1082_s10, %s1078_s9  ;;  %p86_p4 = scmp.eq.s32.totalorder %s712_s14, 1 }
   0x8   : > { %s1146_s18 = scalar_select %p67_p1, %s1086_s11, %s69_s16  }
   0x9   : > { %p1148_p5 = por %p80_p2, %p79_p0  ;;  %p1152_p6 = por %p86_p4, %p85_p3 }
   0xa   : > { %p715_p7 = scmp.ge.s32.totalorder %s1090_s12, 1  ;;  %p116_p8 = scmp.lt.s32.totalorder %s1090_s12, 3 }
   0xc   : > { %p117_p9 = pnand %p715_p7, %p116_p8 }
   0xd   : > { %v1011_v0 = vld [vmem:[%s1273_s1] sm:$0xff] (!%p117_p9)   ;;  %s717_s23 = sshll.u32 (!%p117_p9), %s1131_s13, 5  ;;  %vm266_vm0 = vcmask (!%p117_p9), 130048   ;;  %s135_s28 = sand.u32 (!%p117_p9), 1, %s1082_s10  }
   0xe   : > { %120 = sbr.rel (%p117_p9) target bundleno = 283 (0x11b), region = 28  ;;  %p139_p10 = scmp.lt.s32.totalorder (!%p117_p9), %s717_s23, 63  ;;  %934 = vmatprep.subr.bf16.mxu0 (!%p117_p9), %v1011_v0  ;;  %968 = vmatprep.subr.bf16.mxu1 (!%p117_p9), %v1011_v0 }
   0xf   : > { %935 = vmatpush3.bf16.msra.mxu0 (!%p117_p9), %v1011_v0  ;;  %969 = vmatpush3.bf16.msra.mxu1 (!%p117_p9), %v1011_v0  ;;  %s716_s29 = sshll.u32 (!%p117_p9), %s135_s28, 7  ;;  %s821_s3 = sshll.u32 (!%p117_p9), %s1131_s13, 11 }
  0x10   : > { %s1202_s30 = scalar_lea.vmem (!%p117_p9), [#allocation2], %s716_s29  ;;  %s1221_s7 = scalar_lea.hbm (!%p117_p9), %s1274_s2, %s821_s3 }
  0x11   : > { %s650_s4 = sshll.u32 (!%p117_p9), %s1202_s30, 4  ;;  %s1231_s8 = scalar_lea.sflag (!%p117_p9), [#allocation3], %s135_s28  ;;  %s1223_s4 = int_to_ptr.vmem [resolvable:$true] %s650_s4 }
  0x12   : > { %s1028_s13 = scalar_lea.vmem (!%p117_p9), %s1223_s4, 2048  ;;  %s1092_s14 = smov (!%p117_p9), [#allocation2]  }
  0x13   : > { %p1029_p11 = scmp.ne.s32.totalorder (!%p117_p9), %s1223_s4, %s1028_s13  ;;  %s1032_s16 = sshll.u32 (!%p117_p9), %s1092_s14, 4  ;;  %s1033_s16 = int_to_ptr.vmem [resolvable:$false] %s1032_s16 }
  0x14   : > { %s1034_s17 = scalar_lea.vmem (!%p117_p9), %s1033_s16, 4096  ;;  %p1035_p0 = scmp.lt.s32.totalorder (!%p117_p9), %s1223_s4, %s1033_s16 }
  0x15   : > { %s1282_s23 = smov (!%p139_p10, %s717_s23), 63  ;;  %p1030_p12 = pnand %p1029_p11, %p1148_p5 }
  0x16   : > { %s718_s24 = sshll.u32 %s1282_s23, 2  ;;  %p1036_p1 = scmp.lt.s32.totalorder %s1034_s17, %s1028_s13 }
  0x17   : > { %s1165_s27 = scalar_lea.vmem %s1272_s0, %s718_s24  ;;  %p1031_p13 = pneg %p1030_p12 }
  0x18   : > { %v1012_v1 = vld [vmem:[%s1165_s27] sm:$0xff]   ;;  %v1014_v3 = vld [vmem:[%s1165_s27 + $0x8] sm:$0xff]   ;;  %v1016_v5 = vld [vmem:[%s1165_s27 + $0x10] sm:$0xff]   ;;  %p1037_p2 = por %p1036_p1, %p1035_p0 }
  0x19   : > { %v1013_v2 = vld [vmem:[%s1165_s27 + $0x40] sm:$0xff]   ;;  %936 = vmatprep.mubr.msk.bf16.mxu0 %vm266_vm0, %v1012_v1  ;;  %v1015_v4 = vld [vmem:[%s1165_s27 + $0x48] sm:$0xff]   ;;  %v1017_v6 = vld [vmem:[%s1165_s27 + $0x50] sm:$0xff]  }
  0x1a   : > { %952 = vmatprep.mubr.msk.bf16.mxu1 %vm266_vm0, %v1013_v2  ;;  %937 = vmatmul.mubr.msk.bf16.vlgmr.msra.gmra.mrb[0].mxu0 %vm266_vm0, %v1014_v3  ;;  %v1018_v7 = vld [vmem:[%s1165_s27 + $0x18] sm:$0xff]   ;;  %v1020_v9 = vld [vmem:[%s1165_s27 + $0x20] sm:$0xff]   ;;  %v1022_v11 = vld [vmem:[%s1165_s27 + $0x28] sm:$0xff]   ;;  %p1038_p3 = pnand %p1037_p2, %p1031_p13 }
  0x1b   : > { %953 = vmatmul.mubr.msk.bf16.vlgmr.msra.gmra.mrb[0].mxu1 %vm266_vm0, %v1015_v4  ;;  %940 = vmatprep.mubr.msk.bf16.mxu0 %vm266_vm0, %v1016_v5  ;;  %v1019_v8 = vld [vmem:[%s1165_s27 + $0x58] sm:$0xff]   ;;  %v1021_v10 = vld [vmem:[%s1165_s27 + $0x60] sm:$0xff]   ;;  %v1023_v12 = vld [vmem:[%s1165_s27 + $0x68] sm:$0xff]  }
  0x1c   : > { %956 = vmatprep.mubr.msk.bf16.mxu1 %vm266_vm0, %v1017_v6  ;;  %v1024_v13 = vld [vmem:[%s1165_s27 + $0x30] sm:$0xff]   ;;  %v1026_v15 = vld [vmem:[%s1165_s27 + $0x38] sm:$0xff]  }
  0x1d   : > { %v1025_v14 = vld [vmem:[%s1165_s27 + $0x70] sm:$0xff]   ;;  %v1027_v16 = vld [vmem:[%s1165_s27 + $0x78] sm:$0xff]  }
  0x22   : > { %941 = vmatmul.mubr.msk.bf16.gmra.mrb[4].mxu0 %vm266_vm0, %v1018_v7 }
  0x23   : > { %957 = vmatmul.mubr.msk.bf16.gmra.mrb[4].mxu1 %vm266_vm0, %v1019_v8  ;;  %944 = vmatprep.mubr.msk.bf16.mxu0 %vm266_vm0, %v1020_v9 }
  0x24   : > { %960 = vmatprep.mubr.msk.bf16.mxu1 %vm266_vm0, %v1021_v10 }
  0x2a   : > { %945 = vmatmul.mubr.msk.bf16.gmra.mrb[8].mxu0 %vm266_vm0, %v1022_v11 }
  0x2b   : > { %961 = vmatmul.mubr.msk.bf16.gmra.mrb[8].mxu1 %vm266_vm0, %v1023_v12  ;;  %948 = vmatprep.mubr.msk.bf16.mxu0 %vm266_vm0, %v1024_v13 }
  0x2c   : > { %964 = vmatprep.mubr.msk.bf16.mxu1 %vm266_vm0, %v1025_v14 }
  0x32   : > { %949 = vmatmul.mubr.msk.bf16.gmra.mrb[12].mxu0 %vm266_vm0, %v1026_v15 }
  0x33   : > { %965 = vmatmul.mubr.msk.bf16.gmra.mrb[12].mxu1 %vm266_vm0, %v1027_v16 }
  0xed   : > { %v938_v17 = vpop.f32.mrb[0].mxu0 }
  0xee   : > { %v954_v18 = vpop.f32.mrb[0].mxu1  ;;  %v349_v19 = vpop.f32.mrb[1].mxu0 }
  0xef   : > { %v413_v20 = vpop.f32.mrb[1].mxu1  ;;  %v939_v21 = vpop.f32.mrb[2].mxu0 }
  0xf0   : > { %v830_v22 = vpack.c.bf16 %v939_v21, %v938_v17  ;;  %v955_v23 = vpop.f32.mrb[2].mxu1  ;;  %v352_v24 = vpop.f32.mrb[3].mxu0 }
  0xf1   : > { %v870_v25 = vpack.c.bf16 %v955_v23, %v954_v18  ;;  %v825_v26 = vpack.c.bf16 %v352_v24, %v349_v19  ;;  %v416_v27 = vpop.f32.mrb[3].mxu1 }
  0xf2   : > { %902 = vst [vmem:[%s1202_s30 + $0x8] sm:$0xff] %v830_v22   ;;  %v865_v28 = vpack.c.bf16 %v416_v27, %v413_v20 }
  0xf3   : > { %910 = vst [vmem:[%s1202_s30 + $0x48] sm:$0xff] %v870_v25   ;;  %826 = vst [vmem:[%s1202_s30] sm:$0xff] %v825_v26  }
  0xf4   : > { %909 = vst [vmem:[%s1202_s30 + $0x40] sm:$0xff] %v865_v28  }
  0xf5   : > { %v942_v29 = vpop.f32.mrb[4].mxu0 }
  0xf6   : > { %v958_v30 = vpop.f32.mrb[4].mxu1  ;;  %v365_v31 = vpop.f32.mrb[5].mxu0 }
  0xf7   : > { %v429_v32 = vpop.f32.mrb[5].mxu1  ;;  %v943_v33 = vpop.f32.mrb[6].mxu0 }
  0xf8   : > { %v840_v34 = vpack.c.bf16 %v943_v33, %v942_v29  ;;  %v959_v35 = vpop.f32.mrb[6].mxu1  ;;  %v368_v36 = vpop.f32.mrb[7].mxu0 }
  0xf9   : > { %v880_v37 = vpack.c.bf16 %v959_v35, %v958_v30  ;;  %v835_v38 = vpack.c.bf16 %v368_v36, %v365_v31  ;;  %v432_v39 = vpop.f32.mrb[7].mxu1 }
  0xfa   : > { %904 = vst [vmem:[%s1202_s30 + $0x18] sm:$0xff] %v840_v34   ;;  %v875_v40 = vpack.c.bf16 %v432_v39, %v429_v32 }
  0xfb   : > { %912 = vst [vmem:[%s1202_s30 + $0x58] sm:$0xff] %v880_v37   ;;  %903 = vst [vmem:[%s1202_s30 + $0x10] sm:$0xff] %v835_v38  }
  0xfc   : > { %911 = vst [vmem:[%s1202_s30 + $0x50] sm:$0xff] %v875_v40  }
  0xfd   : > { %v946_v41 = vpop.f32.mrb[8].mxu0 }
  0xfe   : > { %v962_v42 = vpop.f32.mrb[8].mxu1  ;;  %v381_v43 = vpop.f32.mrb[9].mxu0 }
  0xff   : > { %v445_v44 = vpop.f32.mrb[9].mxu1  ;;  %v947_v45 = vpop.f32.mrb[10].mxu0 }
 0x100   : > { %v850_v46 = vpack.c.bf16 %v947_v45, %v946_v41  ;;  %v963_v47 = vpop.f32.mrb[10].mxu1  ;;  %v384_v48 = vpop.f32.mrb[11].mxu0 }
 0x101   : > { %v890_v49 = vpack.c.bf16 %v963_v47, %v962_v42  ;;  %v845_v50 = vpack.c.bf16 %v384_v48, %v381_v43  ;;  %v448_v51 = vpop.f32.mrb[11].mxu1 }
 0x102   : > { %906 = vst [vmem:[%s1202_s30 + $0x28] sm:$0xff] %v850_v46   ;;  %v885_v52 = vpack.c.bf16 %v448_v51, %v445_v44 }
 0x103   : > { %914 = vst [vmem:[%s1202_s30 + $0x68] sm:$0xff] %v890_v49   ;;  %905 = vst [vmem:[%s1202_s30 + $0x20] sm:$0xff] %v845_v50  }
 0x104   : > { %913 = vst [vmem:[%s1202_s30 + $0x60] sm:$0xff] %v885_v52  }
 0x105   : > { %v950_v53 = vpop.f32.mrb[12].mxu0 }
 0x106   : > { %v966_v54 = vpop.f32.mrb[12].mxu1  ;;  %v397_v55 = vpop.f32.mrb[13].mxu0 }
 0x107   : > { %v461_v56 = vpop.f32.mrb[13].mxu1  ;;  %v951_v57 = vpop.f32.mrb[14].mxu0 }
 0x108   : > { %v860_v58 = vpack.c.bf16 %v951_v57, %v950_v53  ;;  %v967_v59 = vpop.f32.mrb[14].mxu1  ;;  %v400_v60 = vpop.f32.mrb[15].mxu0 }
 0x109   : > { %v900_v61 = vpack.c.bf16 %v967_v59, %v966_v54  ;;  %v855_v62 = vpack.c.bf16 %v400_v60, %v397_v55  ;;  %v464_v63 = vpop.f32.mrb[15].mxu1 }
 0x10a   : > { %908 = vst [vmem:[%s1202_s30 + $0x38] sm:$0xff] %v860_v58   ;;  %v895_v0 = vpack.c.bf16 %v464_v63, %v461_v56 }
 0x10b   : > { %916 = vst [vmem:[%s1202_s30 + $0x78] sm:$0xff] %v900_v61   ;;  %907 = vst [vmem:[%s1202_s30 + $0x30] sm:$0xff] %v855_v62  }
 0x10c   : > { %915 = vst [vmem:[%s1202_s30 + $0x70] sm:$0xff] %v895_v0  }
 0x10d   : > { %1041 = shalt.err (!%p1038_p3)
}
 0x10e   : > { %s1042_s21 = scalar_lea.hbm %s1221_s7, 2048  ;;  %s1046_s24 = scalar_lea.hbm %s1274_s2, 4096 }
 0x10f   : > { %p1043_p4 = scmp.ne.s32.totalorder %s1221_s7, %s1042_s21  ;;  %p1047_p9 = scmp.lt.u32.totalorder %s1221_s7, %s1274_s2 }
 0x110   : > { %p1048_p10 = scmp.lt.u32.totalorder %s1046_s24, %s1042_s21  ;;  %p1050_p12 = scmp.lt.u32.totalorder %s1042_s21, %s1221_s7 }
 0x111   : > { %p1044_p7 = pnand %p1043_p4, %p1148_p5 }
 0x112   : > { %p1049_p11 = por %p1048_p10, %p1047_p9 }
 0x113   : > { %p1045_p8 = pneg %p1044_p7 }
 0x114   : > { %p1051_p13 = por %p1050_p12, %p1049_p11 }
 0x116   : > { %p1052_p0 = pnand %p1051_p13, %p1045_p8 }
 0x118   : > { %1055 = shalt.err (!%p1052_p0)
}
 0x119   : > { %s1093_s27 = smov 64   ;;  %s1094_s28 = smov 4  }
 0x11a   : > { %970 = dma.vmem_to_hbm [thread:$0]  (%p1148_p5), %s1223_s4, 2048, %s1221_s7, %s1231_s8, %s1093_s27, %s1093_s27, %s1094_s28  }
 0x11b PF: > { %p976_p1 = scmp.ge.s32.totalorder %s1090_s12, 2  ;;  %s665_s29 = sand.u32 1, %s1078_s9  }
 0x11c   : > { %s666_s30 = scalar_lea.sflag [#allocation3], %s665_s29 }
 0x11d   : > { %p973_p2 = pnand %p976_p1, %p1152_p6 }
 0x11f   : > { %1073 = dma.done.wait (!%p973_p2), %s666_s30, 2048  }
 0x120   : > { %1075 = vsyncadd (!%p973_p2), %s666_s30, 4294965248  ;;  %p12_p3 = scmp.ge.s32.totalorder %s1135_s15, 4   ;;  %s1277_s9 = smov %s1082_s10 }
 0x121   : > { %s1278_s10 = smov %s1086_s11  ;;  %s1279_s11 = smov %s1146_s18 }
 0x122   : > { %s1280_s12 = smov %s1135_s15  ;;  %14 = sbr.rel (!%p12_p3) target bundleno = 3 (0x3), region = 63 }
 0x129   :  { %671 = vsyncpa [#allocation3], 1 }
 0x12a   :  { %673 = vsyncpa [#allocation3 + $0x1], 1 }

</bundles_post_ra>
